<compile_context>
chip_gen: v7x
topology: tpu7x:2x2x1
jax: 0.10.0
libtpu: 0.0.40
codegen_flags: <defaults>
</compile_context>

<pallas_src>
import jax
import jax.numpy as jnp
from jax.experimental import pallas as pl
from jax.experimental.pallas import tpu as pltpu


def _att_kernel(att_ref, feat_ref, out_ref):
    # att_ref : (Rb, 1)   per-row (= per (n, c)) attention scale
    # feat_ref: (Rb, Lb)  lane-dense slab of flattened spatial elements
    # out_ref : (Rb, Lb)
    out_ref[...] = feat_ref[...] * att_ref[...]   # VPU lane-broadcast multiply


def _row_align(dtype):
    # Native sublane tile: (8,128) f32, (16,128) bf16, (32,128) int8/fp8.
    return max(8, 32 // jnp.dtype(dtype).itemsize)


def _chip_budgets(tile_budget_bytes, vmem_limit_bytes):
    """Per-generation tile budget and scoped-VMEM limit."""
    vmem_cap = None
    try:
        info = pltpu.get_tpu_info()
        vmem_cap = getattr(info, "vmem_capacity_bytes", None)
    except Exception:
        vmem_cap = None
    if vmem_cap is not None and vmem_cap > 64 * 1024 * 1024:
        # v5e / v6e class: 128 MiB VMEM -> bigger tiles amortize per-step cost.
        auto_tile, auto_limit = 8 * 1024 * 1024, 64 * 1024 * 1024
    else:
        # v7x class (64 MiB per TensorCore) or unknown: stay conservative.
        auto_tile, auto_limit = 4 * 1024 * 1024, 32 * 1024 * 1024
    tile = auto_tile if tile_budget_bytes is None else tile_budget_bytes
    limit = auto_limit if vmem_limit_bytes is None else vmem_limit_bytes
    return tile, limit


def _select_blocks(nc, hw, itemsize, row_align, tile_budget):
    """Pick a (Rb, Lb) block shape for the (nc, hw) flattened view.

    Every returned dim is either the full array dim or a multiple of its
    hardware alignment (row_align sublanes / 128 lanes), so edge blocks are
    just padded+masked by Pallas; a partial-but-huge full-dim block is never
    produced.
    """
    row_bytes = hw * itemsize

    # Whole array fits in one tile.
    if nc * row_bytes <= tile_budget:
        return nc, hw

    # Preferred: full rows (one contiguous HBM run per tile); shrink Rb to fit.
    rows_fit = tile_budget // row_bytes
    if rows_fit >= row_align:
        rb = (rows_fit // row_align) * row_align
        return rb, hw

    # Full rows too wide even for a minimal aligned row stripe: split lanes.
    rb = nc if nc < row_align else row_align
    if rb * row_bytes <= tile_budget:
        return rb, hw
    if hw <= 128:
        return rb, hw
    lane_elems = max(tile_budget // (rb * itemsize), 128)
    lb = max((min(lane_elems, hw) // 128) * 128, 128)
    return rb, lb


def att_module_forward(
    features: jax.Array,
    attention: jax.Array,
    *,
    tile_budget_bytes=None,
    vmem_limit_bytes=None,
) -> jax.Array:
    """features: (N, C, H, W); attention: (1, C).

    Returns features * attention broadcast over (N, H, W), matching
    ATTModule.forward (unsqueeze + repeat + elementwise mul).
    """
    N, C, H, W = features.shape
    assert attention.shape == (1, C)

    nc, hw = N * C, H * W
    itemsize = jnp.dtype(features.dtype).itemsize

    tile_budget, vmem_limit = _chip_budgets(tile_budget_bytes, vmem_limit_bytes)
    rb, lb = _select_blocks(nc, hw, itemsize, _row_align(features.dtype), tile_budget)

    # Free reshape on row-major NCHW: rows index (n, c), lanes index (h, w).
    feat2d = features.reshape(nc, hw)
    # Per-row attention column: row n*C + c scales by attention[0, c].
    att_col = jnp.broadcast_to(attention.astype(features.dtype), (N, C)).reshape(nc, 1)

    grid = (pl.cdiv(nc, rb), pl.cdiv(hw, lb))

    cost = pl.CostEstimate(
        flops=nc * hw,                                   # one multiply per element
        transcendentals=0,
        bytes_accessed=2 * nc * hw * itemsize + nc * itemsize,
    )

    out2d = pl.pallas_call(
        _att_kernel,
        out_shape=jax.ShapeDtypeStruct((nc, hw), features.dtype),
        grid=grid,
        in_specs=[
            # (Rb, 1) attention column per row tile; constant along lane axis.
            pl.BlockSpec((rb, 1), lambda i, j: (i, 0)),
            # Lane-dense feature slab (full rows whenever the budget allows).
            pl.BlockSpec((rb, lb), lambda i, j: (i, j)),
        ],
        out_specs=pl.BlockSpec((rb, lb), lambda i, j: (i, j)),
        compiler_params=pltpu.CompilerParams(
            dimension_semantics=("parallel", "parallel"),
            vmem_limit_bytes=vmem_limit,
        ),
        cost_estimate=cost,
    )(att_col, feat2d)

    return out2d.reshape(N, C, H, W)


if __name__ == "__main__":
    key = jax.random.PRNGKey(0)
    k_feat, k_att, k_feat2 = jax.random.split(key, 3)

    # Primary example: small shapes consistent with the module.
    N, C, H, W = 2, 4, 16, 16
    features = jax.random.normal(k_feat, (N, C, H, W), dtype=jnp.float32)
    # PyTorch __init__ uses torch.ones(1, in_channels); perturb deterministically
    # so the broadcast multiply is non-trivial to verify.
    attention = jnp.ones((1, C), dtype=jnp.float32) + 0.1 * jax.random.normal(
        k_att, (1, C), dtype=jnp.float32
    )

    out = jax.block_until_ready(att_module_forward(features, attention))
    ref = features * attention.reshape(1, C, 1, 1)
    assert out.shape == features.shape
    assert jnp.allclose(out, ref, atol=1e-6, rtol=1e-6), "mismatch vs reference"

    # Secondary check: odd shapes + a tiny forced tile budget exercise the
    # multi-tile grid and padded/masked edge blocks on both axes.
    N2, C2, H2, W2 = 2, 5, 9, 18
    feats2 = jax.random.normal(k_feat2, (N2, C2, H2, W2), dtype=jnp.float32)
    att2 = jnp.ones((1, C2), dtype=jnp.float32) + 0.05 * jnp.arange(
        C2, dtype=jnp.float32
    )[None, :]
    out2 = jax.block_until_ready(
        att_module_forward(feats2, att2, tile_budget_bytes=512)
    )
    ref2 = feats2 * att2.reshape(1, C2, 1, 1)
    assert jnp.allclose(out2, ref2, atol=1e-6, rtol=1e-6), "edge-block mismatch"

    print("KERNEL_OK")
</pallas_src>

<mosaic_0001>
module attributes {stable_mosaic.version = 11 : i64} {
  func.func @_att_kernel(%arg0: i32, %arg1: i32, %arg2: memref<8x1xf32, #tpu.memory_space<vmem>>, %arg3: memref<8x256xf32, #tpu.memory_space<vmem>>, %arg4: memref<8x256xf32, #tpu.memory_space<vmem>>) attributes {dimension_semantics = [#tpu.dimension_semantics<parallel>, #tpu.dimension_semantics<parallel>], iteration_bounds = array<i64: 1, 1>, scalar_prefetch = 0 : i64, scratch_operands = 0 : i64, tpu.core_type = #tpu.core_type<tc>, window_params = [{transform_indices = @transform_0, window_bounds = array<i64: 8, 1>}, {transform_indices = @transform_1, window_bounds = array<i64: 8, 256>}, {transform_indices = @transform_2, window_bounds = array<i64: 8, 256>}]} {
    %c0 = arith.constant 0 : index
    %c0_0 = arith.constant 0 : index
    %0 = vector.load %arg3[%c0, %c0_0] : memref<8x256xf32, #tpu.memory_space<vmem>>, vector<8x256xf32>
    %c0_1 = arith.constant 0 : index
    %c0_2 = arith.constant 0 : index
    %1 = vector.load %arg2[%c0_1, %c0_2] : memref<8x1xf32, #tpu.memory_space<vmem>>, vector<8x1xf32>
    %2 = vector.broadcast %1 : vector<8x1xf32> to vector<8x256xf32>
    %3 = arith.mulf %0, %2 : vector<8x256xf32>
    %c0_3 = arith.constant 0 : index
    %c0_4 = arith.constant 0 : index
    %4 = vector.load %arg4[%c0_3, %c0_4] : memref<8x256xf32, #tpu.memory_space<vmem>>, vector<8x256xf32>
    tpu.vector_store %arg4[%c0_3, %c0_4], %3 {strides = array<i32>} : memref<8x256xf32, #tpu.memory_space<vmem>>, vector<8x256xf32>,
    return
  }
  func.func @transform_0(%arg0: i32, %arg1: i32) -> (i32, i32) {
    %c0_i32 = arith.constant 0 : i32
    %c0_i32_0 = arith.constant 0 : i32
    return %arg0, %c0_i32 : i32, i32
  }
  func.func @transform_1(%arg0: i32, %arg1: i32) -> (i32, i32) {
    %c0_i32 = arith.constant 0 : i32
    return %arg0, %arg1 : i32, i32
  }
  func.func @transform_2(%arg0: i32, %arg1: i32) -> (i32, i32) {
    %c0_i32 = arith.constant 0 : i32
    return %arg0, %arg1 : i32, i32
  }
}

</mosaic_0001>

<bundles_post_ra>
// kernel: tpu_custom_call.1
= control target key start
LH: loop header
LB: loop body
LE: loop exit
PB: predicated region body
PF: predicated region fallthrough
CT: control target
= control target key end

     0   :  { %7 = vsyncpa [#allocation3], 0  ;;  %s148_s0 = inlined_call_operand.vmem [shape: f32[8,1], index: 0, kind: input, shape index: {}]   ;;  %s149_s1 = inlined_call_operand.hbm [shape: f32[8,256], index: 1, kind: input, shape index: {}]   ;;  %s150_s2 = inlined_call_operand.hbm [shape: f32[8,256], index: 2, kind: output, shape index: {}]  }
   0x1   :  { %8 = vsyncpa [#allocation4], 0  ;;  %s103_s9 = smov [#allocation2]   ;;  %s55_s13 = scalar_lea.hbm %s149_s1, 256 }
   0x2   :  { %s17_s10 = sshll.u32 %s103_s9, 4  ;;  %p56_p0 = scmp.ne.s32.totalorder %s149_s1, %s55_s13  ;;  %s18_s10 = int_to_ptr.vmem [resolvable:$true] %s17_s10 }
   0x3   :  { %p59_p1 = scmp.lt.u32.totalorder %s55_s13, %s149_s1 }
   0x5   :  { %p61_p2 = pnand %p59_p1, %p56_p0 }
   0x7   :  { %64 = shalt.err (!%p61_p2)
}
   0x8   :  { %s65_s18 = scalar_lea.vmem %s18_s10, 256  ;;  %p70_p4 = scmp.lt.s32.totalorder %s18_s10, %s18_s10 }
   0x9   :  { %p66_p3 = scmp.ne.s32.totalorder %s18_s10, %s65_s18  ;;  %p71_p5 = scmp.lt.s32.totalorder %s65_s18, %s65_s18 }
   0xb   :  { %p72_p6 = por %p71_p5, %p70_p4 }
   0xd   :  { %p73_p7 = pnand %p72_p6, %p66_p3 }
   0xf   :  { %76 = shalt.err (!%p73_p7)
}
  0x10   :  { %20 = dma.hbm_to_vmem [thread:$0]  %s149_s1, 256, %s18_s10, [#allocation3]  }
  0x11   :  { %99 = dma.done.wait [#allocation3], 256  }
  0x12   :  { %100 = vsyncadd [#allocation3], 4294967040  ;;  %v104_v0 = vmov 0   ;;  %v26_v1 = vld [vmem:[%s148_s0] sm:$0xff]  ;;  %v25_v3 = vld [vmem:[#allocation2 + $0x8] sm:$0xff]  ;;  %s105_s23 = smov [#allocation5]  }
  0x13   :  { %54 = vset.pattern.permute.xlu0 %v104_v0  ;;  %v24_v2 = vld [vmem:[#allocation2] sm:$0xff]  ;;  %s42_s24 = sshll.u32 %s105_s23, 4  ;;  %s43_s24 = int_to_ptr.vmem [resolvable:$true] %s42_s24 }
  0x14   :  { %29 = vperm.xlu0 %54, %v26_v1   ;;  %s77_s1 = scalar_lea.vmem %s43_s24, 256  ;;  %p82_p9 = scmp.lt.s32.totalorder %s43_s24, %s43_s24 }
  0x15   :  { %p78_p8 = scmp.ne.s32.totalorder %s43_s24, %s77_s1  ;;  %p83_p10 = scmp.lt.s32.totalorder %s77_s1, %s77_s1 }
  0x17   :  { %p84_p11 = por %p83_p10, %p82_p9 }
  0x19   :  { %p85_p12 = pnand %p84_p11, %p78_p8 }
  0x93   :  { %v30_v4 = vpop.permute.xlu0 %29 }
  0x94   :  { %v32_v5 = vmul.f32 %v30_v4, %v24_v2  ;;  %v33_v6 = vmul.f32 %v30_v4, %v25_v3 }
  0x96   :  { %34 = vst [vmem:[#allocation5] sm:$0xff] %v32_v5  ;;  %35 = vst [vmem:[#allocation5 + $0x8] sm:$0xff] %v33_v6 }
  0x97   :  { %88 = shalt.err (!%p85_p12)
}
  0x98   :  { %s89_s26 = scalar_lea.hbm %s150_s2, 256 }
  0x99   :  { %p90_p13 = scmp.ne.s32.totalorder %s150_s2, %s89_s26  ;;  %p93_p0 = scmp.lt.u32.totalorder %s89_s26, %s150_s2 }
  0x9b   :  { %p95_p1 = pnand %p93_p0, %p90_p13 }
  0x9d   :  { %98 = shalt.err (!%p95_p1)
}
  0x9e   :  { %45 = dma.vmem_to_hbm [thread:$0]  %s43_s24, 256, %s150_s2, [#allocation4]  }
  0x9f   :  { %101 = dma.done.wait [#allocation4], 256  }
  0xa0   :  { %102 = vsyncadd [#allocation4], 4294967040 }
  0xa1   :  { %49 = vsyncpa [#allocation3], 1 }
  0xa2   :  { %50 = vsyncpa [#allocation4], 1 }

</bundles_post_ra>
